<compile_context>
chip_gen: v7x
topology: tpu7x:2x2x1
jax: 0.10.0
libtpu: 0.0.40
codegen_flags: <defaults>
</compile_context>

<pallas_src>
import functools
import math

import jax
import jax.numpy as jnp
import numpy as np
from jax import lax
from jax.experimental import pallas as pl
from jax.experimental.pallas import tpu as pltpu


def clip_attention_kernel(
    x_ref,              # (1, S, H)  input dtype (f32)
    wq_ref, bq_ref,     # (H, H) compute dtype (pre-transposed), (1, H) f32
    wk_ref, bk_ref,
    wv_ref, bv_ref,
    wo_ref, bo_ref,
    o_ref,              # (1, S, H)
    ctx_ref,            # VMEM scratch (S, H) f32
    *, num_heads: int, head_size: int, compute_dtype,
):
    scale = 1.0 / math.sqrt(head_size)

    x = x_ref[0].astype(compute_dtype)                          # (S, H)

    # Q/K/V projections: x @ W_t + b on the MXU, f32 accumulation.
    # Scale is folded into q (equivalent to scaling scores by 1/sqrt(d)).
    q = (jnp.dot(x, wq_ref[...], preferred_element_type=jnp.float32)
         + bq_ref[...]) * scale
    k = jnp.dot(x, wk_ref[...], preferred_element_type=jnp.float32) + bk_ref[...]
    v = jnp.dot(x, wv_ref[...], preferred_element_type=jnp.float32) + bv_ref[...]

    q = q.astype(compute_dtype)
    k = k.astype(compute_dtype)
    v = v.astype(compute_dtype)

    # Per-head scaled dot-product attention; each head's context goes straight
    # into the VMEM scratch so head intermediates don't all stay live at once.
    for h in range(num_heads):
        sl = slice(h * head_size, (h + 1) * head_size)
        qh = q[:, sl]                                           # (S, d)
        kh = k[:, sl]                                           # (S, d)
        vh = v[:, sl]                                           # (S, d)
        # scores = qh @ kh^T without materializing a transpose of kh.
        scores = lax.dot_general(
            qh, kh, (((1,), (1,)), ((), ())),
            preferred_element_type=jnp.float32)                 # (S, S)
        # numerically-stable softmax over the key axis
        scores = scores - jnp.max(scores, axis=-1, keepdims=True)
        e = jnp.exp(scores)
        p = e * pl.reciprocal(jnp.sum(e, axis=-1, keepdims=True), approx=True)
        ctx_ref[:, sl] = jnp.dot(p.astype(compute_dtype), vh,
                                 preferred_element_type=jnp.float32)

    ctx = ctx_ref[...].astype(compute_dtype)                    # (S, H)
    out = jnp.dot(ctx, wo_ref[...], preferred_element_type=jnp.float32) + bo_ref[...]
    # dropout == identity in eval mode
    o_ref[0] = out.astype(o_ref.dtype)


def clip_attention(x, params, *, num_heads: int, compute_dtype=jnp.bfloat16):
    """x: [B, S, H] float32; params: dict of wq,bq,wk,bk,wv,bv,wo,bo (nn.Linear layout)."""
    B, S, H = x.shape
    assert H % num_heads == 0
    head_size = H // num_heads

    # Pre-transpose weights once (nn.Linear: y = x @ W.T + b  ->  kernel uses W_t = W.T)
    # and cast to the MXU compute dtype. Biases stay f32 (added to f32 accumulators).
    wq_t = params["wq"].T.astype(compute_dtype)
    wk_t = params["wk"].T.astype(compute_dtype)
    wv_t = params["wv"].T.astype(compute_dtype)
    wo_t = params["wo"].T.astype(compute_dtype)
    bq = params["bq"].reshape(1, H).astype(jnp.float32)
    bk = params["bk"].reshape(1, H).astype(jnp.float32)
    bv = params["bv"].reshape(1, H).astype(jnp.float32)
    bo = params["bo"].reshape(1, H).astype(jnp.float32)

    w_spec = pl.BlockSpec((H, H), lambda b: (0, 0))     # grid-invariant weight tile
    b_spec = pl.BlockSpec((1, H), lambda b: (0, 0))     # grid-invariant bias tile

    kernel = functools.partial(
        clip_attention_kernel,
        num_heads=num_heads, head_size=head_size, compute_dtype=compute_dtype,
    )

    w_bytes = 4 * H * H * np.dtype(compute_dtype).itemsize + 4 * H * 4
    io_bytes = 2 * B * S * H * np.dtype(x.dtype).itemsize
    cost = pl.CostEstimate(
        flops=B * (8 * S * H * H + 4 * S * S * H),
        transcendentals=B * num_heads * S * S,
        bytes_accessed=w_bytes + io_bytes,
    )

    return pl.pallas_call(
        kernel,
        out_shape=jax.ShapeDtypeStruct((B, S, H), x.dtype),
        grid_spec=pltpu.PrefetchScalarGridSpec(
            num_scalar_prefetch=0,
            grid=(B,),
            in_specs=[
                pl.BlockSpec((1, S, H), lambda b: (b, 0, 0)),   # x
                w_spec, b_spec,                                  # q_proj
                w_spec, b_spec,                                  # k_proj
                w_spec, b_spec,                                  # v_proj
                w_spec, b_spec,                                  # out_proj
            ],
            out_specs=pl.BlockSpec((1, S, H), lambda b: (b, 0, 0)),
            scratch_shapes=[pltpu.VMEM((S, H), jnp.float32)],    # per-head ctx scratch
        ),
        compiler_params=pltpu.CompilerParams(
            dimension_semantics=("parallel",),
            vmem_limit_bytes=64 * 1024 * 1024,
        ),
        cost_estimate=cost,
    )(x, wq_t, bq, wk_t, bk, wv_t, bv, wo_t, bo)


def reference_clip_attention(x, params, *, num_heads: int):
    """Pure-JAX reference mirroring the PyTorch forward pass (eval mode)."""
    B, S, H = x.shape
    hs = H // num_heads

    def lin(x, w, b):
        return jnp.einsum("bsh,oh->bso", x, w) + b

    q = lin(x, params["wq"], params["bq"]).reshape(B, S, num_heads, hs).transpose(0, 2, 1, 3)
    k = lin(x, params["wk"], params["bk"]).reshape(B, S, num_heads, hs).transpose(0, 2, 1, 3)
    v = lin(x, params["wv"], params["bv"]).reshape(B, S, num_heads, hs).transpose(0, 2, 1, 3)

    scores = jnp.einsum("bnqd,bnkd->bnqk", q, k) / math.sqrt(hs)
    p = jax.nn.softmax(scores, axis=-1)
    ctx = jnp.einsum("bnqk,bnkd->bnqd", p, v)
    ctx = ctx.transpose(0, 2, 1, 3).reshape(B, S, H)
    return lin(ctx, params["wo"], params["bo"])


if __name__ == "__main__":
    # Small config consistent with the module: hidden=32, heads=4, seq=8, batch=2
    B, S, H = 2, 8, 32
    num_heads = 4

    key = jax.random.PRNGKey(0)
    keys = jax.random.split(key, 9)
    scale = 0.05
    params = {
        "wq": scale * jax.random.normal(keys[0], (H, H), jnp.float32),
        "bq": scale * jax.random.normal(keys[1], (H,), jnp.float32),
        "wk": scale * jax.random.normal(keys[2], (H, H), jnp.float32),
        "bk": scale * jax.random.normal(keys[3], (H,), jnp.float32),
        "wv": scale * jax.random.normal(keys[4], (H, H), jnp.float32),
        "bv": scale * jax.random.normal(keys[5], (H,), jnp.float32),
        "wo": scale * jax.random.normal(keys[6], (H, H), jnp.float32),
        "bo": scale * jax.random.normal(keys[7], (H,), jnp.float32),
    }
    x = jax.random.normal(keys[8], (B, S, H), jnp.float32)

    ref = reference_clip_attention(x, params, num_heads=num_heads)

    # Full-precision path (tight correctness check).
    out_f32 = clip_attention(x, params, num_heads=num_heads, compute_dtype=jnp.float32)
    out_f32 = jax.block_until_ready(out_f32)
    np.testing.assert_allclose(np.asarray(out_f32), np.asarray(ref), atol=5e-4, rtol=5e-4)

    # Default bf16-matmul path (MXU-peak dtype on v6e/v7x), f32 accumulation.
    out_bf16 = clip_attention(x, params, num_heads=num_heads)
    out_bf16 = jax.block_until_ready(out_bf16)
    np.testing.assert_allclose(np.asarray(out_bf16), np.asarray(ref), atol=1e-2, rtol=1e-2)

    print("KERNEL_OK")
</pallas_src>

<mosaic_0001>
module attributes {stable_mosaic.version = 11 : i64} {
  func.func @clip_attention_kernel(%arg0: i32, %arg1: memref<1x8x32xf32, #tpu.memory_space<vmem>>, %arg2: memref<32x32xf32, #tpu.memory_space<vmem>>, %arg3: memref<1x32xf32, #tpu.memory_space<vmem>>, %arg4: memref<32x32xf32, #tpu.memory_space<vmem>>, %arg5: memref<1x32xf32, #tpu.memory_space<vmem>>, %arg6: memref<32x32xf32, #tpu.memory_space<vmem>>, %arg7: memref<1x32xf32, #tpu.memory_space<vmem>>, %arg8: memref<32x32xf32, #tpu.memory_space<vmem>>, %arg9: memref<1x32xf32, #tpu.memory_space<vmem>>, %arg10: memref<1x8x32xf32, #tpu.memory_space<vmem>>, %arg11: memref<8x32xf32, #tpu.memory_space<vmem>>) attributes {dimension_semantics = [#tpu.dimension_semantics<parallel>], iteration_bounds = array<i64: 2>, scalar_prefetch = 0 : i64, scratch_operands = 1 : i64, tpu.core_type = #tpu.core_type<tc>, window_params = [{transform_indices = @transform_0, window_bounds = array<i64: 1, 8, 32>}, {pipeline_mode = #tpu.pipeline_mode<synchronous>, transform_indices = @transform_1, window_bounds = array<i64: 32, 32>}, {pipeline_mode = #tpu.pipeline_mode<synchronous>, transform_indices = @transform_2, window_bounds = array<i64: 1, 32>}, {pipeline_mode = #tpu.pipeline_mode<synchronous>, transform_indices = @transform_3, window_bounds = array<i64: 32, 32>}, {pipeline_mode = #tpu.pipeline_mode<synchronous>, transform_indices = @transform_4, window_bounds = array<i64: 1, 32>}, {pipeline_mode = #tpu.pipeline_mode<synchronous>, transform_indices = @transform_5, window_bounds = array<i64: 32, 32>}, {pipeline_mode = #tpu.pipeline_mode<synchronous>, transform_indices = @transform_6, window_bounds = array<i64: 1, 32>}, {pipeline_mode = #tpu.pipeline_mode<synchronous>, transform_indices = @transform_7, window_bounds = array<i64: 32, 32>}, {pipeline_mode = #tpu.pipeline_mode<synchronous>, transform_indices = @transform_8, window_bounds = array<i64: 1, 32>}, {transform_indices = @transform_9, window_bounds = array<i64: 1, 8, 32>}]} {
    %c0 = arith.constant 0 : index
    %c0_0 = arith.constant 0 : index
    %c0_1 = arith.constant 0 : index
    %0 = vector.load %arg1[%c0, %c0_0, %c0_1] : memref<1x8x32xf32, #tpu.memory_space<vmem>>, vector<1x8x32xf32>
    %1 = vector.shape_cast %0 : vector<1x8x32xf32> to vector<8x32xf32>
    %c0_2 = arith.constant 0 : index
    %c0_3 = arith.constant 0 : index
    %2 = vector.load %arg2[%c0_2, %c0_3] : memref<32x32xf32, #tpu.memory_space<vmem>>, vector<32x32xf32>
    %cst = arith.constant dense<0.000000e+00> : vector<8x32xf32>
    %3 = tpu.matmul %1, %2, %cst {dimension_numbers = #tpu.dot_dimension_numbers<[1], [0], [0], [1], [0, 0, 1, 1], [], []>} : vector<8x32xf32>, vector<32x32xf32>, vector<8x32xf32> -> vector<8x32xf32>
    %c0_4 = arith.constant 0 : index
    %c0_5 = arith.constant 0 : index
    %4 = vector.load %arg3[%c0_4, %c0_5] : memref<1x32xf32, #tpu.memory_space<vmem>>, vector<1x32xf32>
    %5 = vector.broadcast %4 : vector<1x32xf32> to vector<8x32xf32>
    %6 = arith.addf %3, %5 : vector<8x32xf32>
    %cst_6 = arith.constant 0.353553385 : f32
    %7 = vector.broadcast %cst_6 : f32 to vector<8x32xf32>
    %8 = arith.mulf %6, %7 : vector<8x32xf32>
    %c0_7 = arith.constant 0 : index
    %c0_8 = arith.constant 0 : index
    %9 = vector.load %arg4[%c0_7, %c0_8] : memref<32x32xf32, #tpu.memory_space<vmem>>, vector<32x32xf32>
    %cst_9 = arith.constant dense<0.000000e+00> : vector<8x32xf32>
    %10 = tpu.matmul %1, %9, %cst_9 {dimension_numbers = #tpu.dot_dimension_numbers<[1], [0], [0], [1], [0, 0, 1, 1], [], []>} : vector<8x32xf32>, vector<32x32xf32>, vector<8x32xf32> -> vector<8x32xf32>
    %c0_10 = arith.constant 0 : index
    %c0_11 = arith.constant 0 : index
    %11 = vector.load %arg5[%c0_10, %c0_11] : memref<1x32xf32, #tpu.memory_space<vmem>>, vector<1x32xf32>
    %12 = vector.broadcast %11 : vector<1x32xf32> to vector<8x32xf32>
    %13 = arith.addf %10, %12 : vector<8x32xf32>
    %c0_12 = arith.constant 0 : index
    %c0_13 = arith.constant 0 : index
    %14 = vector.load %arg6[%c0_12, %c0_13] : memref<32x32xf32, #tpu.memory_space<vmem>>, vector<32x32xf32>
    %cst_14 = arith.constant dense<0.000000e+00> : vector<8x32xf32>
    %15 = tpu.matmul %1, %14, %cst_14 {dimension_numbers = #tpu.dot_dimension_numbers<[1], [0], [0], [1], [0, 0, 1, 1], [], []>} : vector<8x32xf32>, vector<32x32xf32>, vector<8x32xf32> -> vector<8x32xf32>
    %c0_15 = arith.constant 0 : index
    %c0_16 = arith.constant 0 : index
    %16 = vector.load %arg7[%c0_15, %c0_16] : memref<1x32xf32, #tpu.memory_space<vmem>>, vector<1x32xf32>
    %17 = vector.broadcast %16 : vector<1x32xf32> to vector<8x32xf32>
    %18 = arith.addf %15, %17 : vector<8x32xf32>
    %19 = vector.extract_strided_slice %8 {offsets = [0, 0], sizes = [8, 8], strides = [1, 1]} : vector<8x32xf32> to vector<8x8xf32>
    %20 = vector.extract_strided_slice %13 {offsets = [0, 0], sizes = [8, 8], strides = [1, 1]} : vector<8x32xf32> to vector<8x8xf32>
    %21 = vector.extract_strided_slice %18 {offsets = [0, 0], sizes = [8, 8], strides = [1, 1]} : vector<8x32xf32> to vector<8x8xf32>
    %cst_17 = arith.constant dense<0.000000e+00> : vector<8x8xf32>
    %22 = tpu.matmul %19, %20, %cst_17 {dimension_numbers = #tpu.dot_dimension_numbers<[1], [1], [0], [0], [0, 0, 1, 0], [], []>} : vector<8x8xf32>, vector<8x8xf32>, vector<8x8xf32> -> vector<8x8xf32>
    %cst_18 = arith.constant dense<0xFF800000> : vector<8xf32>
    %23 = vector.multi_reduction <maximumf>, %22, %cst_18 [1] : vector<8x8xf32> to vector<8xf32>
    %24 = vector.shape_cast %23 : vector<8xf32> to vector<8x1xf32>
    %25 = vector.broadcast %24 : vector<8x1xf32> to vector<8x8xf32>
    %26 = arith.subf %22, %25 : vector<8x8xf32>
    %27 = math.exp %26 : vector<8x8xf32>
    %cst_19 = arith.constant dense<0.000000e+00> : vector<8xf32>
    %28 = vector.multi_reduction <add>, %27, %cst_19 [1] : vector<8x8xf32> to vector<8xf32>
    %29 = vector.shape_cast %28 : vector<8xf32> to vector<8x1xf32>
    %30 = tpu.reciprocal %29 {approx = true} : vector<8x1xf32> -> vector<8x1xf32>
    %31 = vector.broadcast %30 : vector<8x1xf32> to vector<8x8xf32>
    %32 = arith.mulf %27, %31 : vector<8x8xf32>
    %cst_20 = arith.constant dense<0.000000e+00> : vector<8x8xf32>
    %33 = tpu.matmul %32, %21, %cst_20 {dimension_numbers = #tpu.dot_dimension_numbers<[1], [0], [0], [1], [0, 0, 1, 1], [], []>} : vector<8x8xf32>, vector<8x8xf32>, vector<8x8xf32> -> vector<8x8xf32>
    %c0_21 = arith.constant 0 : index
    %c0_22 = arith.constant 0 : index
    %34 = vector.load %arg11[%c0_21, %c0_22] : memref<8x32xf32, #tpu.memory_space<vmem>>, vector<8x8xf32>
    tpu.vector_store %arg11[%c0_21, %c0_22], %33 {strides = array<i32>} : memref<8x32xf32, #tpu.memory_space<vmem>>, vector<8x8xf32>,
    %35 = vector.extract_strided_slice %8 {offsets = [0, 8], sizes = [8, 8], strides = [1, 1]} : vector<8x32xf32> to vector<8x8xf32>
    %36 = vector.extract_strided_slice %13 {offsets = [0, 8], sizes = [8, 8], strides = [1, 1]} : vector<8x32xf32> to vector<8x8xf32>
    %37 = vector.extract_strided_slice %18 {offsets = [0, 8], sizes = [8, 8], strides = [1, 1]} : vector<8x32xf32> to vector<8x8xf32>
    %cst_23 = arith.constant dense<0.000000e+00> : vector<8x8xf32>
    %38 = tpu.matmul %35, %36, %cst_23 {dimension_numbers = #tpu.dot_dimension_numbers<[1], [1], [0], [0], [0, 0, 1, 0], [], []>} : vector<8x8xf32>, vector<8x8xf32>, vector<8x8xf32> -> vector<8x8xf32>
    %cst_24 = arith.constant dense<0xFF800000> : vector<8xf32>
    %39 = vector.multi_reduction <maximumf>, %38, %cst_24 [1] : vector<8x8xf32> to vector<8xf32>
    %40 = vector.shape_cast %39 : vector<8xf32> to vector<8x1xf32>
    %41 = vector.broadcast %40 : vector<8x1xf32> to vector<8x8xf32>
    %42 = arith.subf %38, %41 : vector<8x8xf32>
    %43 = math.exp %42 : vector<8x8xf32>
    %cst_25 = arith.constant dense<0.000000e+00> : vector<8xf32>
    %44 = vector.multi_reduction <add>, %43, %cst_25 [1] : vector<8x8xf32> to vector<8xf32>
    %45 = vector.shape_cast %44 : vector<8xf32> to vector<8x1xf32>
    %46 = tpu.reciprocal %45 {approx = true} : vector<8x1xf32> -> vector<8x1xf32>
    %47 = vector.broadcast %46 : vector<8x1xf32> to vector<8x8xf32>
    %48 = arith.mulf %43, %47 : vector<8x8xf32>
    %cst_26 = arith.constant dense<0.000000e+00> : vector<8x8xf32>
    %49 = tpu.matmul %48, %37, %cst_26 {dimension_numbers = #tpu.dot_dimension_numbers<[1], [0], [0], [1], [0, 0, 1, 1], [], []>} : vector<8x8xf32>, vector<8x8xf32>, vector<8x8xf32> -> vector<8x8xf32>
    %c0_27 = arith.constant 0 : index
    %c8 = arith.constant 8 : index
    %50 = vector.load %arg11[%c0_27, %c8] : memref<8x32xf32, #tpu.memory_space<vmem>>, vector<8x8xf32>
    tpu.vector_store %arg11[%c0_27, %c8], %49 {strides = array<i32>} : memref<8x32xf32, #tpu.memory_space<vmem>>, vector<8x8xf32>,
    %51 = vector.extract_strided_slice %8 {offsets = [0, 16], sizes = [8, 8], strides = [1, 1]} : vector<8x32xf32> to vector<8x8xf32>
    %52 = vector.extract_strided_slice %13 {offsets = [0, 16], sizes = [8, 8], strides = [1, 1]} : vector<8x32xf32> to vector<8x8xf32>
    %53 = vector.extract_strided_slice %18 {offsets = [0, 16], sizes = [8, 8], strides = [1, 1]} : vector<8x32xf32> to vector<8x8xf32>
    %cst_28 = arith.constant dense<0.000000e+00> : vector<8x8xf32>
    %54 = tpu.matmul %51, %52, %cst_28 {dimension_numbers = #tpu.dot_dimension_numbers<[1], [1], [0], [0], [0, 0, 1, 0], [], []>} : vector<8x8xf32>, vector<8x8xf32>, vector<8x8xf32> -> vector<8x8xf32>
    %cst_29 = arith.constant dense<0xFF800000> : vector<8xf32>
    %55 = vector.multi_reduction <maximumf>, %54, %cst_29 [1] : vector<8x8xf32> to vector<8xf32>
    %56 = vector.shape_cast %55 : vector<8xf32> to vector<8x1xf32>
    %57 = vector.broadcast %56 : vector<8x1xf32> to vector<8x8xf32>
    %58 = arith.subf %54, %57 : vector<8x8xf32>
    %59 = math.exp %58 : vector<8x8xf32>
    %cst_30 = arith.constant dense<0.000000e+00> : vector<8xf32>
    %60 = vector.multi_reduction <add>, %59, %cst_30 [1] : vector<8x8xf32> to vector<8xf32>
    %61 = vector.shape_cast %60 : vector<8xf32> to vector<8x1xf32>
    %62 = tpu.reciprocal %61 {approx = true} : vector<8x1xf32> -> vector<8x1xf32>
    %63 = vector.broadcast %62 : vector<8x1xf32> to vector<8x8xf32>
    %64 = arith.mulf %59, %63 : vector<8x8xf32>
    %cst_31 = arith.constant dense<0.000000e+00> : vector<8x8xf32>
    %65 = tpu.matmul %64, %53, %cst_31 {dimension_numbers = #tpu.dot_dimension_numbers<[1], [0], [0], [1], [0, 0, 1, 1], [], []>} : vector<8x8xf32>, vector<8x8xf32>, vector<8x8xf32> -> vector<8x8xf32>
    %c0_32 = arith.constant 0 : index
    %c16 = arith.constant 16 : index
    %66 = vector.load %arg11[%c0_32, %c16] : memref<8x32xf32, #tpu.memory_space<vmem>>, vector<8x8xf32>
    tpu.vector_store %arg11[%c0_32, %c16], %65 {strides = array<i32>} : memref<8x32xf32, #tpu.memory_space<vmem>>, vector<8x8xf32>,
    %67 = vector.extract_strided_slice %8 {offsets = [0, 24], sizes = [8, 8], strides = [1, 1]} : vector<8x32xf32> to vector<8x8xf32>
    %68 = vector.extract_strided_slice %13 {offsets = [0, 24], sizes = [8, 8], strides = [1, 1]} : vector<8x32xf32> to vector<8x8xf32>
    %69 = vector.extract_strided_slice %18 {offsets = [0, 24], sizes = [8, 8], strides = [1, 1]} : vector<8x32xf32> to vector<8x8xf32>
    %cst_33 = arith.constant dense<0.000000e+00> : vector<8x8xf32>
    %70 = tpu.matmul %67, %68, %cst_33 {dimension_numbers = #tpu.dot_dimension_numbers<[1], [1], [0], [0], [0, 0, 1, 0], [], []>} : vector<8x8xf32>, vector<8x8xf32>, vector<8x8xf32> -> vector<8x8xf32>
    %cst_34 = arith.constant dense<0xFF800000> : vector<8xf32>
    %71 = vector.multi_reduction <maximumf>, %70, %cst_34 [1] : vector<8x8xf32> to vector<8xf32>
    %72 = vector.shape_cast %71 : vector<8xf32> to vector<8x1xf32>
    %73 = vector.broadcast %72 : vector<8x1xf32> to vector<8x8xf32>
    %74 = arith.subf %70, %73 : vector<8x8xf32>
    %75 = math.exp %74 : vector<8x8xf32>
    %cst_35 = arith.constant dense<0.000000e+00> : vector<8xf32>
    %76 = vector.multi_reduction <add>, %75, %cst_35 [1] : vector<8x8xf32> to vector<8xf32>
    %77 = vector.shape_cast %76 : vector<8xf32> to vector<8x1xf32>
    %78 = tpu.reciprocal %77 {approx = true} : vector<8x1xf32> -> vector<8x1xf32>
    %79 = vector.broadcast %78 : vector<8x1xf32> to vector<8x8xf32>
    %80 = arith.mulf %75, %79 : vector<8x8xf32>
    %cst_36 = arith.constant dense<0.000000e+00> : vector<8x8xf32>
    %81 = tpu.matmul %80, %69, %cst_36 {dimension_numbers = #tpu.dot_dimension_numbers<[1], [0], [0], [1], [0, 0, 1, 1], [], []>} : vector<8x8xf32>, vector<8x8xf32>, vector<8x8xf32> -> vector<8x8xf32>
    %c0_37 = arith.constant 0 : index
    %c24 = arith.constant 24 : index
    %82 = vector.load %arg11[%c0_37, %c24] : memref<8x32xf32, #tpu.memory_space<vmem>>, vector<8x8xf32>
    tpu.vector_store %arg11[%c0_37, %c24], %81 {strides = array<i32>} : memref<8x32xf32, #tpu.memory_space<vmem>>, vector<8x8xf32>,
    %c0_38 = arith.constant 0 : index
    %c0_39 = arith.constant 0 : index
    %83 = vector.load %arg11[%c0_38, %c0_39] : memref<8x32xf32, #tpu.memory_space<vmem>>, vector<8x32xf32>
    %c0_40 = arith.constant 0 : index
    %c0_41 = arith.constant 0 : index
    %84 = vector.load %arg8[%c0_40, %c0_41] : memref<32x32xf32, #tpu.memory_space<vmem>>, vector<32x32xf32>
    %cst_42 = arith.constant dense<0.000000e+00> : vector<8x32xf32>
    %85 = tpu.matmul %83, %84, %cst_42 {dimension_numbers = #tpu.dot_dimension_numbers<[1], [0], [0], [1], [0, 0, 1, 1], [], []>} : vector<8x32xf32>, vector<32x32xf32>, vector<8x32xf32> -> vector<8x32xf32>
    %c0_43 = arith.constant 0 : index
    %c0_44 = arith.constant 0 : index
    %86 = vector.load %arg9[%c0_43, %c0_44] : memref<1x32xf32, #tpu.memory_space<vmem>>, vector<1x32xf32>
    %87 = vector.broadcast %86 : vector<1x32xf32> to vector<8x32xf32>
    %88 = arith.addf %85, %87 : vector<8x32xf32>
    %c0_45 = arith.constant 0 : index
    %c0_46 = arith.constant 0 : index
    %c0_47 = arith.constant 0 : index
    %89 = vector.load %arg10[%c0_45, %c0_46, %c0_47] : memref<1x8x32xf32, #tpu.memory_space<vmem>>, vector<1x8x32xf32>
    %90 = vector.shape_cast %89 : vector<1x8x32xf32> to vector<8x32xf32>
    %91 = vector.shape_cast %88 : vector<8x32xf32> to vector<1x8x32xf32>
    tpu.vector_store %arg10[%c0_45, %c0_46, %c0_47], %91 {strides = array<i32>} : memref<1x8x32xf32, #tpu.memory_space<vmem>>, vector<1x8x32xf32>,
    return
  }
  func.func @transform_0(%arg0: i32) -> (i32, i32, i32) {
    %c0_i32 = arith.constant 0 : i32
    %c0_i32_0 = arith.constant 0 : i32
    %c0_i32_1 = arith.constant 0 : i32
    return %arg0, %c0_i32, %c0_i32_0 : i32, i32, i32
  }
  func.func @transform_1(%arg0: i32) -> (i32, i32) {
    %c0_i32 = arith.constant 0 : i32
    %c0_i32_0 = arith.constant 0 : i32
    %c0_i32_1 = arith.constant 0 : i32
    return %c0_i32, %c0_i32_0 : i32, i32
  }
  func.func @transform_2(%arg0: i32) -> (i32, i32) {
    %c0_i32 = arith.constant 0 : i32
    %c0_i32_0 = arith.constant 0 : i32
    %c0_i32_1 = arith.constant 0 : i32
    return %c0_i32, %c0_i32_0 : i32, i32
  }
  func.func @transform_3(%arg0: i32) -> (i32, i32) {
    %c0_i32 = arith.constant 0 : i32
    %c0_i32_0 = arith.constant 0 : i32
    %c0_i32_1 = arith.constant 0 : i32
    return %c0_i32, %c0_i32_0 : i32, i32
  }
  func.func @transform_4(%arg0: i32) -> (i32, i32) {
    %c0_i32 = arith.constant 0 : i32
    %c0_i32_0 = arith.constant 0 : i32
    %c0_i32_1 = arith.constant 0 : i32
    return %c0_i32, %c0_i32_0 : i32, i32
  }
  func.func @transform_5(%arg0: i32) -> (i32, i32) {
    %c0_i32 = arith.constant 0 : i32
    %c0_i32_0 = arith.constant 0 : i32
    %c0_i32_1 = arith.constant 0 : i32
    return %c0_i32, %c0_i32_0 : i32, i32
  }
  func.func @transform_6(%arg0: i32) -> (i32, i32) {
    %c0_i32 = arith.constant 0 : i32
    %c0_i32_0 = arith.constant 0 : i32
    %c0_i32_1 = arith.constant 0 : i32
    return %c0_i32, %c0_i32_0 : i32, i32
  }
  func.func @transform_7(%arg0: i32) -> (i32, i32) {
    %c0_i32 = arith.constant 0 : i32
    %c0_i32_0 = arith.constant 0 : i32
    %c0_i32_1 = arith.constant 0 : i32
    return %c0_i32, %c0_i32_0 : i32, i32
  }
  func.func @transform_8(%arg0: i32) -> (i32, i32) {
    %c0_i32 = arith.constant 0 : i32
    %c0_i32_0 = arith.constant 0 : i32
    %c0_i32_1 = arith.constant 0 : i32
    return %c0_i32, %c0_i32_0 : i32, i32
  }
  func.func @transform_9(%arg0: i32) -> (i32, i32, i32) {
    %c0_i32 = arith.constant 0 : i32
    %c0_i32_0 = arith.constant 0 : i32
    %c0_i32_1 = arith.constant 0 : i32
    return %arg0, %c0_i32, %c0_i32_0 : i32, i32, i32
  }
}

</mosaic_0001>

<bundles_post_ra>
// kernel: tpu_custom_call.1
= control target key start
LH: loop header
LB: loop body
LE: loop exit
PB: predicated region body
PF: predicated region fallthrough
CT: control target
= control target key end

     0   :  { %s2842_s0 = inlined_call_operand.hbm [shape: f32[2,8,32], index: 0, kind: input, shape index: {}]   ;;  %s2843_s1 = inlined_call_operand.hbm [shape: f32[32,32], index: 1, kind: input, shape index: {}]   ;;  %s2844_s2 = inlined_call_operand.hbm [shape: f32[1,32], index: 2, kind: input, shape index: {}]   ;;  %s2845_s3 = inlined_call_operand.hbm [shape: f32[32,32], index: 3, kind: input, shape index: {}]   ;;  %s2846_s4 = inlined_call_operand.hbm [shape: f32[1,32], index: 4, kind: input, shape index: {}]   ;;  %s2847_s5 = inlined_call_operand.hbm [shape: f32[32,32], index: 5, kind: input, shape index: {}]   ;;  %s2848_s6 = inlined_call_operand.hbm [shape: f32[1,32], index: 6, kind: input, shape index: {}]   ;;  %s2849_s7 = inlined_call_operand.hbm [shape: f32[32,32], index: 7, kind: input, shape index: {}]   ;;  %s2850_s8 = inlined_call_operand.hbm [shape: f32[1,32], index: 8, kind: input, shape index: {}]   ;;  %s2851_s9 = inlined_call_operand.hbm [shape: f32[2,8,32], index: 9, kind: output, shape index: {}]  }
   0x1   :  { %2856 = sst [smem:[#allocation25_spill]] %s2843_s1 }
   0x2   :  { %2857 = sst [smem:[#allocation26_spill]] %s2851_s9 }
   0x3   :  { %14 = vsyncpa [#allocation4], 0 }
   0x4   :  { %16 = vsyncpa [#allocation4 + $0x1], 0 }
   0x5   :  { %17 = vsyncpa [#allocation7], 0 }
   0x6   :  { %18 = vsyncpa [#allocation10], 0 }
   0x7   :  { %19 = vsyncpa [#allocation13], 0 }
   0x8   :  { %20 = vsyncpa [#allocation16], 0 }
   0x9   :  { %21 = vsyncpa [#allocation5], 0 }
   0xa   :  { %23 = vsyncpa [#allocation5 + $0x1], 0  ;;  %s2382_s30 = smov 0   ;;  %s2384_s10 = smov 0  }
   0xb   :  { %s2386_s11 = smov 0   ;;  %s2388_s12 = smov 0  }
   0xc LB: > { %s2311_s13 = smov [#allocation6]   ;;  %s2403_s15 = sadd.s32 4294967295, %s2309_s12   ;;  %s2309_s12 = sphi %s2388_s12, %s2884_s12   ;;  %s2305_s11 = sphi %s2386_s11, %s2883_s11   ;;  %s2301_s10 = sphi %s2384_s10, %s2882_s10   ;;  %s2297_s30 = sphi %s2382_s30, %s2881_s30  }
   0xd   : > { %s266_s14 = sshll.u32 %s2311_s13, 4  ;;  %p1628_p0 = scmp.ge.s32.totalorder %s2309_s12, 1  ;;  %s2408_s14 = int_to_ptr.vmem [resolvable:$true] %s266_s14 }
   0xe   : > { %p2853_p1 = scmp.eq.s32.totalorder %s2403_s15, 0  ;;  %p254_p2 = scmp.lt.s32.totalorder %s2309_s12, 3 }
   0xf   : > { %s2312_s17 = smov [#allocation9]   ;;  %s2313_s20 = smov [#allocation12]  }
  0x10   : > { %p2410_p3 = pnand %p1628_p0, %p254_p2  ;;  %s290_s18 = sshll.u32 %s2312_s17, 4  ;;  %s2423_s18 = int_to_ptr.vmem [resolvable:$true] %s290_s18 }
  0x11   : > { %s314_s21 = sshll.u32 %s2313_s20, 4  ;;  %s2860_s1 = sld [smem:[#allocation25_spill]]  ;;  %s2425_s21 = int_to_ptr.vmem [resolvable:$true] %s314_s21 }
  0x12   : > { %s2858_s16 = scalar_select %p2410_p3, 1, 0 }
  0x13   : > { %p1855_p5 = pneg %p2410_p3 }
  0x15   : > { %p2419_p6 = pnand %p1855_p5, %p2853_p1 }
  0x17   : > { %s1973_s24 = scalar_lea.hbm %s2860_s1, 512  ;;  %p2435_p8 = pneg %p2419_p6 }
  0x18   : > { %p1974_p7 = scmp.ne.s32.totalorder %s2860_s1, %s1973_s24  ;;  %p1980_p11 = scmp.lt.u32.totalorder %s1973_s24, %s2860_s1 }
  0x1a   : > { %p1976_p9 = pnand %p2435_p8, %p1974_p7 }
  0x1c   : > { %p1977_p10 = pneg %p1976_p9 }
  0x1e   : > { %p1982_p12 = pnand %p1980_p11, %p1977_p10 }
  0x20   : > { %1985 = shalt.err (!%p1982_p12)
}
  0x21   : > { %s1986_s13 = scalar_lea.vmem %s2408_s14, 512  ;;  %p1994_p5 = scmp.lt.s32.totalorder %s2408_s14, %s2408_s14 }
  0x22   : > { %p1987_p13 = scmp.ne.s32.totalorder %s2408_s14, %s1986_s13  ;;  %p1995_p4 = scmp.lt.s32.totalorder %s1986_s13, %s1986_s13 }
  0x24   : > { %p1989_p0 = pnand %p1987_p13, %p2435_p8  ;;  %p1996_p7 = por %p1995_p4, %p1994_p5 }
  0x26   : > { %p1990_p2 = pneg %p1989_p0 }
  0x28   : > { %p1997_p9 = pnand %p1996_p7, %p1990_p2 }
  0x2a   : > { %2000 = shalt.err (!%p1997_p9)
}
  0x2b   : > { %s2314_s17 = smov 128   ;;  %s2315_s20 = smov 8  }
  0x2c   : > { %1858 = dma.hbm_to_vmem [thread:$0]  (!%p2419_p6), %s2860_s1, 512, %s2408_s14, [#allocation7], %s2314_s17, %s2314_s17, %s2315_s20  }
  0x2d   : > { %s2001_s26 = scalar_lea.hbm %s2845_s3, 512 }
  0x2e   : > { %p2002_p4 = scmp.ne.s32.totalorder %s2845_s3, %s2001_s26  ;;  %p2008_p12 = scmp.lt.u32.totalorder %s2001_s26, %s2845_s3 }
  0x30   : > { %p2004_p10 = pnand %p2002_p4, %p2435_p8 }
  0x32   : > { %p2005_p11 = pneg %p2004_p10 }
  0x34   : > { %p2010_p13 = pnand %p2008_p12, %p2005_p11 }
  0x36   : > { %2013 = shalt.err (!%p2010_p13)
}
  0x37   : > { %s2014_s14 = scalar_lea.vmem %s2423_s18, 512  ;;  %p2022_p7 = scmp.lt.s32.totalorder %s2423_s18, %s2423_s18 }
  0x38   : > { %p2015_p0 = scmp.ne.s32.totalorder %s2423_s18, %s2014_s14  ;;  %p2023_p9 = scmp.lt.s32.totalorder %s2014_s14, %s2014_s14 }
  0x3a   : > { %p2017_p2 = pnand %p2015_p0, %p2435_p8  ;;  %p2024_p4 = por %p2023_p9, %p2022_p7 }
  0x3c   : > { %p2018_p5 = pneg %p2017_p2 }
  0x3e   : > { %p2025_p10 = pnand %p2024_p4, %p2018_p5 }
  0x40   : > { %2028 = shalt.err (!%p2025_p10)
}
  0x41   : > { %1864 = dma.hbm_to_vmem [thread:$0]  (!%p2419_p6), %s2845_s3, 512, %s2423_s18, [#allocation10], %s2314_s17, %s2314_s17, %s2315_s20  }
  0x42   : > { %s2029_s25 = scalar_lea.hbm %s2847_s5, 512 }
  0x43   : > { %p2030_p11 = scmp.ne.s32.totalorder %s2847_s5, %s2029_s25  ;;  %p2036_p0 = scmp.lt.u32.totalorder %s2029_s25, %s2847_s5 }
  0x45   : > { %p2032_p12 = pnand %p2030_p11, %p2435_p8 }
  0x47   : > { %p2033_p13 = pneg %p2032_p12 }
  0x49   : > { %p2038_p2 = pnand %p2036_p0, %p2033_p13 }
  0x4b   : > { %2041 = shalt.err (!%p2038_p2)
}
  0x4c   : > { %s2042_s18 = scalar_lea.vmem %s2425_s21, 512  ;;  %p2050_p4 = scmp.lt.s32.totalorder %s2425_s21, %s2425_s21 }
  0x4d   : > { %p2043_p5 = scmp.ne.s32.totalorder %s2425_s21, %s2042_s18  ;;  %p2051_p10 = scmp.lt.s32.totalorder %s2042_s18, %s2042_s18 }
  0x4f   : > { %p2045_p7 = pnand %p2043_p5, %p2435_p8  ;;  %p2052_p11 = por %p2051_p10, %p2050_p4 }
  0x51   : > { %p2046_p9 = pneg %p2045_p7 }
  0x53   : > { %p2053_p12 = pnand %p2052_p11, %p2046_p9 }
  0x55   : > { %2056 = shalt.err (!%p2053_p12)
}
  0x56   : > { %1870 = dma.hbm_to_vmem [thread:$0]  (!%p2419_p6), %s2847_s5, 512, %s2425_s21, [#allocation13], %s2314_s17, %s2314_s17, %s2315_s20  }
  0x57   : > { %s2316_s22 = smov [#allocation15]   ;;  %s2317_s24 = smov [#allocation8]  }
  0x58   : > { %s338_s23 = sshll.u32 %s2316_s22, 4  ;;  %s280_s25 = sshll.u32 %s2317_s24, 4  ;;  %s339_s23 = int_to_ptr.vmem [resolvable:$true] %s338_s23  ;;  %s281_s25 = int_to_ptr.vmem [resolvable:$true] %s280_s25 }
  0x59   : > { %s2057_s29 = scalar_lea.hbm %s2849_s7, 512 }
  0x5a   : > { %p2058_p13 = scmp.ne.s32.totalorder %s2849_s7, %s2057_s29  ;;  %p2064_p5 = scmp.lt.u32.totalorder %s2057_s29, %s2849_s7 }
  0x5c   : > { %p2060_p0 = pnand %p2058_p13, %p2435_p8 }
  0x5e   : > { %p2061_p2 = pneg %p2060_p0 }
  0x60   : > { %p2066_p7 = pnand %p2064_p5, %p2061_p2 }
  0x62   : > { %2069 = shalt.err (!%p2066_p7)
}
  0x63   : > { %s2070_s21 = scalar_lea.vmem %s339_s23, 512  ;;  %p2078_p11 = scmp.lt.s32.totalorder %s339_s23, %s339_s23 }
  0x64   : > { %p2071_p9 = scmp.ne.s32.totalorder %s339_s23, %s2070_s21  ;;  %p2079_p12 = scmp.lt.s32.totalorder %s2070_s21, %s2070_s21 }
  0x66   : > { %p2073_p4 = pnand %p2071_p9, %p2435_p8  ;;  %p2080_p1 = por %p2079_p12, %p2078_p11 }
  0x68   : > { %p2074_p10 = pneg %p2073_p4 }
  0x6a   : > { %p2081_p3 = pnand %p2080_p1, %p2074_p10 }
  0x6c   : > { %2084 = shalt.err (!%p2081_p3)
}
  0x6d   : > { %1876 = dma.hbm_to_vmem [thread:$0]  (!%p2419_p6), %s2849_s7, 512, %s339_s23, [#allocation16], %s2314_s17, %s2314_s17, %s2315_s20  }
  0x6e   : > { %s2085_s26 = scalar_lea.hbm %s2844_s2, 16 }
  0x6f   : > { %p2086_p1 = scmp.ne.s32.totalorder %s2844_s2, %s2085_s26  ;;  %p2092_p0 = scmp.lt.u32.totalorder %s2085_s26, %s2844_s2 }
  0x71   : > { %p2088_p3 = pnand %p2086_p1, %p2435_p8 }
  0x73   : > { %p2089_p13 = pneg %p2088_p3 }
  0x75   : > { %p2094_p2 = pnand %p2092_p0, %p2089_p13 }
  0x77   : > { %2097 = shalt.err (!%p2094_p2)
}
  0x78   : > { %s2098_s14 = scalar_lea.vmem %s281_s25, 16  ;;  %s2105_s17 = scalar_lea.vmem %s281_s25, 32 }
  0x79   : > { %p2099_p5 = scmp.ne.s32.totalorder %s281_s25, %s2098_s14  ;;  %p2106_p4 = scmp.lt.s32.totalorder %s281_s25, %s281_s25 }
  0x7a   : > { %p2107_p10 = scmp.lt.s32.totalorder %s2105_s17, %s2098_s14 }
  0x7b   : > { %p2101_p7 = pnand %p2099_p5, %p2435_p8 }
  0x7c   : > { %p2108_p11 = por %p2107_p10, %p2106_p4 }
  0x7d   : > { %p2102_p9 = pneg %p2101_p7 }
  0x7f   : > { %p2109_p12 = pnand %p2108_p11, %p2102_p9 }
  0x81   : > { %2112 = shalt.err (!%p2109_p12)
}
  0x82   : > { %1861 = dma.hbm_to_vmem [thread:$0]  (!%p2419_p6), %s2844_s2, 16, %s281_s25, [#allocation7]  }
  0x83   : > { %s2318_s21 = smov [#allocation11]   ;;  %s2319_s9 = smov [#allocation14]  }
  0x84   : > { %s304_s1 = sshll.u32 %s2318_s21, 4  ;;  %s328_s22 = sshll.u32 %s2319_s9, 4  ;;  %s305_s1 = int_to_ptr.vmem [resolvable:$true] %s304_s1  ;;  %s329_s22 = int_to_ptr.vmem [resolvable:$true] %s328_s22 }
  0x85   : > { %s2113_s28 = scalar_lea.hbm %s2846_s4, 16 }
  0x86   : > { %p2114_p1 = scmp.ne.s32.totalorder %s2846_s4, %s2113_s28  ;;  %p2120_p0 = scmp.lt.u32.totalorder %s2113_s28, %s2846_s4 }
  0x88   : > { %p2116_p3 = pnand %p2114_p1, %p2435_p8 }
  0x8a   : > { %p2117_p13 = pneg %p2116_p3 }
  0x8c   : > { %p2122_p2 = pnand %p2120_p0, %p2117_p13 }
  0x8e   : > { %2125 = shalt.err (!%p2122_p2)
}
  0x8f   : > { %s2126_s25 = scalar_lea.vmem %s305_s1, 16  ;;  %s2133_s17 = scalar_lea.vmem %s305_s1, 32 }
  0x90   : > { %p2127_p5 = scmp.ne.s32.totalorder %s305_s1, %s2126_s25  ;;  %p2134_p4 = scmp.lt.s32.totalorder %s305_s1, %s305_s1 }
  0x91   : > { %p2135_p10 = scmp.lt.s32.totalorder %s2133_s17, %s2126_s25 }
  0x92   : > { %p2129_p7 = pnand %p2127_p5, %p2435_p8 }
  0x93   : > { %p2136_p11 = por %p2135_p10, %p2134_p4 }
  0x94   : > { %p2130_p9 = pneg %p2129_p7 }
  0x96   : > { %p2137_p12 = pnand %p2136_p11, %p2130_p9 }
  0x98   : > { %2140 = shalt.err (!%p2137_p12)
}
  0x99   : > { %1867 = dma.hbm_to_vmem [thread:$0]  (!%p2419_p6), %s2846_s4, 16, %s305_s1, [#allocation10]  }
  0x9a   : > { %s2141_s24 = scalar_lea.hbm %s2848_s6, 16 }
  0x9b   : > { %p2142_p1 = scmp.ne.s32.totalorder %s2848_s6, %s2141_s24  ;;  %p2148_p0 = scmp.lt.u32.totalorder %s2141_s24, %s2848_s6 }
  0x9d   : > { %p2144_p3 = pnand %p2142_p1, %p2435_p8 }
  0x9f   : > { %p2145_p13 = pneg %p2144_p3 }
  0xa1   : > { %p2150_p2 = pnand %p2148_p0, %p2145_p13 }
  0xa3   : > { %2153 = shalt.err (!%p2150_p2)
}
  0xa4   : > { %s2154_s18 = scalar_lea.vmem %s329_s22, 16  ;;  %s2161_s1 = scalar_lea.vmem %s329_s22, 32 }
  0xa5   : > { %p2155_p5 = scmp.ne.s32.totalorder %s329_s22, %s2154_s18  ;;  %p2162_p4 = scmp.lt.s32.totalorder %s329_s22, %s329_s22 }
  0xa6   : > { %p2163_p10 = scmp.lt.s32.totalorder %s2161_s1, %s2154_s18 }
  0xa7   : > { %p2157_p7 = pnand %p2155_p5, %p2435_p8 }
  0xa8   : > { %p2164_p11 = por %p2163_p10, %p2162_p4 }
  0xa9   : > { %p2158_p9 = pneg %p2157_p7 }
  0xab   : > { %p2165_p12 = pnand %p2164_p11, %p2158_p9 }
  0xad   : > { %2168 = shalt.err (!%p2165_p12)
}
  0xae   : > { %1873 = dma.hbm_to_vmem [thread:$0]  (!%p2419_p6), %s2848_s6, 16, %s329_s22, [#allocation13]  }
  0xaf   : > { %s2320_s17 = smov [#allocation17]   ;;  %s2169_s9 = scalar_lea.hbm %s2850_s8, 16 }
  0xb0   : > { %s352_s20 = sshll.u32 %s2320_s17, 4  ;;  %p2170_p1 = scmp.ne.s32.totalorder %s2850_s8, %s2169_s9  ;;  %s353_s20 = int_to_ptr.vmem [resolvable:$true] %s352_s20 }
  0xb1   : > { %p2176_p0 = scmp.lt.u32.totalorder %s2169_s9, %s2850_s8 }
  0xb2   : > { %p2172_p3 = pnand %p2170_p1, %p2435_p8 }
  0xb4   : > { %p2173_p13 = pneg %p2172_p3 }
  0xb6   : > { %p2178_p2 = pnand %p2176_p0, %p2173_p13 }
  0xb8   : > { %2181 = shalt.err (!%p2178_p2)
}
  0xb9   : > { %s2182_s22 = scalar_lea.vmem %s353_s20, 16  ;;  %s2189_s13 = scalar_lea.vmem %s353_s20, 32 }
  0xba   : > { %p2183_p5 = scmp.ne.s32.totalorder %s353_s20, %s2182_s22  ;;  %p2190_p4 = scmp.lt.s32.totalorder %s353_s20, %s353_s20 }
  0xbb   : > { %p2191_p10 = scmp.lt.s32.totalorder %s2189_s13, %s2182_s22 }
  0xbc   : > { %p2185_p7 = pnand %p2183_p5, %p2435_p8 }
  0xbd   : > { %p2192_p11 = por %p2191_p10, %p2190_p4 }
  0xbe   : > { %p2186_p9 = pneg %p2185_p7 }
  0xc0   : > { %p2193_p12 = pnand %p2192_p11, %p2186_p9 }
  0xc2   : > { %2196 = shalt.err (!%p2193_p12)
}
  0xc3   : > { %1879 = dma.hbm_to_vmem [thread:$0]  (!%p2419_p6), %s2850_s8, 16, %s353_s20, [#allocation16]  }
  0xc4   : > { %s1627_s27 = sadd.s32 4294967294, %s2309_s12   ;;  %s2606_s19 = sadd.s32 1, %s2309_s12  }
  0xc5   : > { %s33_s14 = ssub.s32 %s2309_s12, %s2606_s19  ;;  %s36_s25 = sadd.s32 1, %s2305_s11 }
  0xc6   : > { %p34_p8 = scmp.eq.s32.totalorder %s33_s14, 0  ;;  %p43_p1 = scmp.ne.s32.totalorder %s2305_s11, %s2301_s10 }
  0xc7   : > { %p44_p3 = scmp.eq.s32.totalorder %s2309_s12, 0  ;;  %p49_p13 = scmp.ne.s32.totalorder %s2301_s10, %s2297_s30 }
  0xc8   : > { %s2617_s17 = scalar_select %p34_p8, %s2305_s11, %s36_s25  }
  0xc9   : > { %p2619_p0 = por %p44_p3, %p43_p1  ;;  %p2863_p2 = scmp.eq.s32.totalorder %s2403_s15, 0 }
  0xca   : > { %p241_p5 = scmp.eq.s32.totalorder %s2403_s15, 1  ;;  %p247_p7 = scmp.eq.s32.totalorder %s1627_s27, 1 }
  0xcb   : > { %p2625_p6 = por %p2863_p2, %p49_p13  ;;  %p1896_p9 = scmp.lt.s32.totalorder %s2309_s12, 2 }
  0xcc   : > { %s363_s21 = sand.u32 1, %s2305_s11   ;;  %p2632_p4 = por %p241_p5, %p43_p1 }
  0xcd   : > { %p2636_p10 = por %p247_p7, %p49_p13  ;;  %s1638_s26 = sshll.u32 %s363_s21, 3 }
  0xce   : > { %s2865_s9 = scalar_select %p2632_p4, 1, 0 }
  0xcf   : > { %s2866_s24 = scalar_select %p2636_p10, 1, 0 }
  0xd0   : > { %s1639_s28 = sshll.u32 %s2309_s12, 7  ;;  %s367_s18 = scalar_lea.vmem [#allocation3], %s1638_s26 }
  0xd1   : > { %s2644_s13 = scalar_lea.hbm %s2842_s0, %s1639_s28  ;;  %s374_s1 = sshll.u32 %s367_s18, 4  ;;  %s2646_s1 = int_to_ptr.vmem [resolvable:$true] %s374_s1 }
  0xd2   : > { %p2650_p11 = pnand %p1896_p9, %p2619_p0  ;;  %s364_s14 = scalar_lea.sflag [#allocation4], %s363_s21 }
  0xd3   : > { %s2197_s25 = scalar_lea.hbm %s2644_s13, 128  ;;  %s2202_s29 = scalar_lea.hbm %s2842_s0, 256 }
  0xd4   : > { %p2198_p12 = scmp.ne.s32.totalorder %s2644_s13, %s2197_s25  ;;  %p2199_p8 = pneg %p2650_p11 }
  0xd5   : > { %p2203_p13 = scmp.lt.u32.totalorder %s2644_s13, %s2842_s0  ;;  %p2204_p0 = scmp.lt.u32.totalorder %s2202_s29, %s2197_s25 }
  0xd6   : > { %p2200_p1 = pnand %p2199_p8, %p2198_p12  ;;  %p2206_p5 = scmp.lt.u32.totalorder %s2197_s25, %s2644_s13 }
  0xd7   : > { %p2205_p2 = por %p2204_p0, %p2203_p13 }
  0xd8   : > { %p2201_p3 = pneg %p2200_p1 }
  0xd9   : > { %p2207_p7 = por %p2206_p5, %p2205_p2 }
  0xdb   : > { %p2208_p9 = pnand %p2207_p7, %p2201_p3 }
  0xdd   : > { %2211 = shalt.err (!%p2208_p9)
}
  0xde   : > { %s2212_s21 = scalar_lea.vmem %s2646_s1, 128  ;;  %s2321_s18 = smov [#allocation3]  }
  0xdf   : > { %p2213_p12 = scmp.ne.s32.totalorder %s2646_s1, %s2212_s21  ;;  %s2217_s26 = sshll.u32 %s2321_s18, 4  ;;  %s2218_s26 = int_to_ptr.vmem [resolvable:$false] %s2217_s26 }
  0xe0   : > { %s2219_s28 = scalar_lea.vmem %s2218_s26, 256  ;;  %p2220_p4 = scmp.lt.s32.totalorder %s2646_s1, %s2218_s26 }
  0xe1   : > { %p2215_p1 = pnand %p2213_p12, %p2199_p8  ;;  %p2221_p13 = scmp.lt.s32.totalorder %s2219_s28, %s2212_s21 }
  0xe3   : > { %p2216_p10 = pneg %p2215_p1  ;;  %p2222_p0 = por %p2221_p13, %p2220_p4 }
  0xe5   : > { %p2223_p2 = pnand %p2222_p0, %p2216_p10 }
  0xe7   : > { %2226 = shalt.err (!%p2223_p2)
}
  0xe8   : > { %1883 = dma.hbm_to_vmem [thread:$0]  (!%p2650_p11), %s2644_s13, 128, %s2646_s1, %s364_s14  }
  0xe9   : > { %p2868_p3 = scmp.ne.s32.totalorder %s2858_s16, 0 }
  0xea   : > { %s2682_s25 = sand.u32 (!%p2868_p3), 1, %s2301_s10  }
  0xeb   : > { %383 = sbr.rel (%p2868_p3) target bundleno = 2166 (0x876), region = 56  ;;  %s1641_s29 = sshll.u32 (!%p2868_p3), %s2682_s25, 3 }
  0xec   : > { %s386_s23 = scalar_lea.sflag (!%p2868_p3), [#allocation4], %s2682_s25  ;;  %s2688_s22 = scalar_lea.vmem (!%p2868_p3), [#allocation3], %s1641_s29 }
  0xf2   : > { %2272 = dma.done.wait (%p2625_p6), %s386_s23, 128  }
  0xf3   : > { %2274 = vsyncadd (%p2625_p6), %s386_s23, 4294967168  ;;  %p2869_p4 = scmp.eq.s32.totalorder %s2403_s15, 0 }
  0xf5   : > { %2276 = dma.done.wait (%p2869_p4), [#allocation7], 528   ;;  %p2870_p10 = pmov %p2869_p4 }
  0xf6   : > { %p2871_p11 = pmov %p2869_p4 }
  0xf7   : > { %2278 = vsyncadd (%p2870_p10), [#allocation7], 4294966768 }
  0xf8   : > { %2280 = dma.done.wait (%p2871_p11), [#allocation10], 528   ;;  %p2872_p8 = pmov %p2869_p4 }
  0xf9   : > { %p2873_p5 = pmov %p2869_p4 }
  0xfa   : > { %2282 = vsyncadd (%p2872_p8), [#allocation10], 4294966768 }
  0xfb   : > { %2284 = dma.done.wait (%p2873_p5), [#allocation13], 528   ;;  %p2874_p7 = pmov %p2869_p4 }
  0xfc   : > { %p2875_p6 = pmov %p2869_p4 }
  0xfd   : > { %2286 = vsyncadd (%p2874_p7), [#allocation13], 4294966768 }
  0xfe   : > { %2288 = dma.done.wait (%p2875_p6), [#allocation16], 528   ;;  %p2876_p9 = pmov %p2869_p4 }
  0xff   : > { %v2322_v0 = vmov 0.0|0.0   ;;  %vm2323_vm0 = vmmov 0   ;;  %v2324_v1 = vmov 0.0   ;;  %v543_v2 = vld [vmem:[#allocation9] sm:$0xff]  ;;  %v544_v3 = vld [vmem:[#allocation9 + $0x8] sm:$0xff]  ;;  %v545_v7 = vld [vmem:[#allocation9 + $0x10] sm:$0xff] }
 0x100   : > { %2290 = vsyncadd (%p2876_p9), [#allocation16], 4294966768  ;;  %1801 = vmatprep.subr.bf16.mxu1 %v2322_v0  ;;  %1795 = vmatprep.subr.bf16.mxu0 %v2322_v0  ;;  %v457_v4 = vld [vmem:[#allocation6] sm:$0xff]  ;;  %v1802_v5 = vpack.c.bf16 %v544_v3, %v543_v2  ;;  %v458_v6 = vld [vmem:[#allocation6 + $0x8] sm:$0xff]  ;;  %vm468_vm1 = vcmask 261120   ;;  %vm705_vm2 = vcmask 64512  }
 0x101   : > { %1730 = vmatprep.mubr.msk.f32.mxu1 %vm2323_vm0, %v2324_v1  ;;  %1719 = vmatprep.mubr.msk.f32.mxu0 %vm2323_vm0, %v2324_v1  ;;  %v546_v8 = vld [vmem:[#allocation9 + $0x18] sm:$0xff]  ;;  %v1796_v9 = vpack.c.bf16 %v458_v6, %v457_v4  ;;  %v459_v10 = vld [vmem:[#allocation6 + $0x10] sm:$0xff]  ;;  %v1653_v15 = vld [vmem:[#allocation11] ss:$0 sm:$0xff]  ;;  %s2325_s16 = smov 120   ;;  %s2326_s20 = smov 112  }
 0x102   : > { %v460_v11 = vld [vmem:[#allocation6 + $0x18] sm:$0xff]  ;;  %1803 = vmatpush3.bf16.msra.mxu1 %v1802_v5  ;;  %v1805_v12 = vpack.c.bf16 %v546_v8, %v545_v7  ;;  %v1651_v16 = vld [vmem:[#allocation8] ss:$0 sm:$0xff]  ;;  %s2327_s13 = smov 104   ;;  %v624_v24 = vld [vmem:[#allocation12] sm:$0xff]  ;;  %s2328_s1 = smov 8  }
 0x103   : > { %1797 = vmatpush3.bf16.msra.mxu0 %v1796_v9  ;;  %1804 = vmatprep.subr.bf16.mxu1 %v2322_v0  ;;  %v1799_v13 = vpack.c.bf16 %v460_v11, %v459_v10  ;;  %v456_v14 = vld [vmem:[%s2688_s22] sm:$0xff]  ;;  %v1655_v38 = vld [vmem:[#allocation14] ss:$0 sm:$0xff]  ;;  %s2329_s27 = smov 16   ;;  %s2330_s14 = smov 24   ;;  %vm1037_vm3 = vcmask 130112  }
 0x104   : > { %1798 = vmatprep.subr.bf16.mxu0 %v2322_v0  ;;  %v625_v25 = vld [vmem:[#allocation12 + $0x8] sm:$0xff]  ;;  %v626_v26 = vld [vmem:[#allocation12 + $0x10] sm:$0xff]  ;;  %v627_v28 = vld [vmem:[#allocation12 + $0x18] sm:$0xff]  ;;  %vm1208_vm4 = vcmask 195712   ;;  %vm1379_vm5 = vcmask 261312   ;;  %s1672_s21 = sshll.u32 %s2403_s15, 7 }
 0x105   : > { %v1808_v27 = vpack.c.bf16 %v625_v25, %v624_v24  ;;  %v1811_v29 = vpack.c.bf16 %v627_v28, %v626_v26  ;;  %v1383_v28 = vld [vmem:[#allocation15 + $0x8] sm:$0xff]  ;;  %s455_s18 = scalar_lea.vmem [#allocation18], %s1641_s29  ;;  %s2877_s22 = sld [smem:[#allocation26_spill]] }
 0x106   : > { %1806 = vmatpush3.bf16.msra.mxu1 %v1805_v12  ;;  %s1481_s26 = sshll.u32 %s455_s18, 4  ;;  %p2878_p1 = scmp.ne.s32.totalorder %s2865_s9, 0  ;;  %s2799_s26 = int_to_ptr.vmem [resolvable:$true] %s1481_s26 }
 0x107   : > { %1800 = vmatpush3.bf16.msra.mxu0 %v1799_v13  ;;  %1744 = vmatprep.subr.mxu1 %v2324_v1  ;;  %s2227_s15 = scalar_lea.vmem %s2799_s26, 128  ;;  %s2331_s29 = smov [#allocation18]  }
 0x108   : > { %1807 = vmatprep.subr.bf16.mxu0 %v2322_v0  ;;  %p2228_p12 = scmp.ne.s32.totalorder %s2799_s26, %s2227_s15 }
 0x109   : > { %1731 = vmatmul.mubr.msk.f32.vlgmr.msra.gmra.mrb[0].mxu1 %vm468_vm1, %v456_v14 }
 0x10a   : > { %1720 = vmatmul.mubr.msk.f32.vlgmr.msra.gmra.mrb[0].mxu0 %vm468_vm1, %v456_v14  ;;  %1746 = vmatprep.mubr.msk.f32.mxu1 %vm2323_vm0, %v2324_v1  ;;  %p2229_p13 = pnand %p2228_p12, %p2878_p1 }
 0x10b   : > { %1741 = vmatprep.mubr.msk.f32.mxu0 %vm2323_vm0, %v2324_v1  ;;  %1809 = vmatpush3.bf16.msra.mxu0 %v1808_v27  ;;  %v1382_v27 = vld [vmem:[#allocation15] sm:$0xff] }
 0x10c   : > { %1810 = vmatprep.subr.bf16.mxu0 %v2322_v0  ;;  %p2230_p0 = pneg %p2229_p13 }
 0x10f   : > { %1812 = vmatpush3.bf16.msra.mxu0 %v1811_v29  ;;  %v1814_v29 = vpack.c.bf16 %v1383_v28, %v1382_v27 }
 0x110   : > { %1764 = vmatprep.subr.mxu0 %v2324_v1 }
 0x112   : > { %1742 = vmatmul.mubr.msk.f32.vlgmr.msra.gmra.mrb[2].mxu0 %vm468_vm1, %v456_v14 }
 0x113   : > { %1766 = vmatprep.mubr.msk.f32.mxu0 %vm2323_vm0, %v2324_v1 }
 0x1dc   : > { %v620_v17 = vpop.f32.mrb[0].mxu1 }
 0x1dd   : > { %v621_v18 = vadd.f32 %v1653_v15, %v620_v17  ;;  %v538_v19 = vpop.f32.mrb[0].mxu0  ;;  %v1732_v20 = vpop.f32.mrb[1].mxu1 }
 0x1de   : > { %v539_v21 = vadd.f32 %v1651_v16, %v538_v19  ;;  %v1721_v22 = vpop.f32.mrb[1].mxu0 }
 0x1df   : > { %869 = vrot.lane.b32.xlu1 %v621_v18, %s2325_s16  ;;  %1745 = vmatpush3.xpose.msk.msra.mxu1 %vm705_vm2, %v621_v18 }
 0x1e0   : > { %v542_v23 = vmul.f32 0.35355338, %v539_v21  ;;  %1749 = vmatprep.subr.mxu1 %v2324_v1 }
 0x1e2   : > { %1747 = vmatmul.mubr.msk.f32.vlgmr.msra.gmra.mrb[2].mxu1 %vm705_vm2, %v542_v23 }
 0x1e3   : > { %867 = vrot.lane.b32.xlu1 %v542_v23, %s2325_s16  ;;  %1751 = vmatprep.mubr.msk.f32.mxu1 %vm2323_vm0, %v2324_v1 }
 0x1e5   : > { %v701_v39 = vpop.f32.mrb[2].mxu0 }
 0x1e6   : > { %v2744_v40 = vadd.f32 %v1655_v38, %v701_v39  ;;  %v1743_v41 = vpop.f32.mrb[3].mxu0 }
 0x1e7   : > { %1039 = vrot.lane.b32.xlu1 %v542_v23, %s2326_s20  ;;  %v1669_v41 = vld [vmem:[#allocation17] ss:$0 sm:$0xff] }
 0x1e8   : > { %1750 = vmatpush3.msra.mxu1 %v2744_v40 }
 0x1e9   : > { %1754 = vmatprep.subr.mxu1 %v2324_v1 }
 0x1eb   : > { %1212 = vrot.lane.b32.xlu1 %v621_v18, %s2327_s13 }
 0x1ef   : > { %1210 = vrot.lane.b32.xlu1 %v542_v23, %s2327_s13 }
 0x251   : > { %v870_v42 = vpop.permute.xlu1 %869 }
 0x255   : > { %v868_v43 = vpop.permute.xlu1 %867 }
 0x259   : > { %v1040_v44 = vpop.permute.xlu1 %1039 }
 0x25d   : > { %v1213_v47 = vpop.permute.xlu1 %1212 }
 0x261   : > { %v1211_v49 = vpop.permute.xlu1 %1210 }
 0x2b5   : > { %v778_v30 = vpop.f32.mrb[2].mxu1 }
 0x2b6   : > { %v1748_v31 = vpop.f32.mrb[3].mxu1  ;;  %v782_v32 = vsel %vm705_vm2, %v778_v30, -inf }
 0x2b7   : > { %783 = vmax.xlane.f32.xlu0 %v782_v32  ;;  %v1385_v31 = vld [vmem:[#allocation15 + $0x18] sm:$0xff] }
 0x344   : > { %v784_v33 = vpop.xlane.xlu0 %783 }
 0x345   : > { %v785_v34 = vsub.f32 %v778_v30, %v784_v33  ;;  %v1384_v30 = vld [vmem:[#allocation15 + $0x10] sm:$0xff] }
 0x346   : > { %v1817_v32 = vpack.c.bf16 %v1385_v31, %v1384_v30 }
 0x347   : > { %v786_v35 = vmul.f32 1.442695, %v785_v34 }
 0x349   : > { %1957 = vpow2.f32 %v786_v35 }
 0x353   : > { %v1958_v36 = vpop.eup %1957 }
 0x354   : > { %v788_v37 = vsel %vm705_vm2, %v1958_v36, 0.0 }
 0x355   : > { %789 = vadd.xlane.f32.xlu0 %v788_v37 }
 0x36b   : > { %1041 = vrot.lane.b32.xlu0 %v621_v18, %s2326_s20 }
 0x3e2   : > { %v790_v45 = vpop.xlane.xlu0 %789 }
 0x3e3   : > { %1959 = vrcp.f32 %v790_v45 }
 0x3e6   : > { %v1042_v46 = vpop.permute.xlu0 %1041 }
 0x3e7   : > { %1765 = vmatpush3.xpose.msk.msra.mxu0 %vm705_vm2, %v1042_v46 }
 0x3e8   : > { %1774 = vmatprep.subr.mxu0 %v2324_v1 }
 0x3ea   : > { %1767 = vmatmul.mubr.msk.f32.vlgmr.msra.gmra.mrb[4].mxu0 %vm705_vm2, %v1040_v44 }
 0x3eb   : > { %1775 = vmatpush3.xpose.msk.msra.mxu0 %vm705_vm2, %v1213_v47  ;;  %1776 = vmatprep.mubr.msk.f32.mxu0 %vm2323_vm0, %v2324_v1 }
 0x3ec   : > { %1813 = vmatprep.subr.bf16.mxu0 %v2322_v0 }
 0x3ed   : > { %v1960_v48 = vpop.eup %1959 }
 0x3ee   : > { %v792_v50 = vmul.f32 %v1960_v48, %v1958_v36  ;;  %1777 = vmatmul.mubr.msk.f32.vlgmr.msra.gmra.mrb[6].mxu0 %vm705_vm2, %v1211_v49 }
 0x3ef   : > { %1792 = vmatprep.mubr.msk.f32.mxu0 %vm2323_vm0, %v2324_v1  ;;  %1815 = vmatpush3.bf16.msra.mxu0 %v1814_v29 }
 0x3f0   : > { %1752 = vmatmul.mubr.msk.f32.vlgmr.msra.gmra.mrb[4].mxu1 %vm705_vm2, %v792_v50  ;;  %1816 = vmatprep.subr.bf16.mxu0 %v2322_v0 }
 0x3f1   : > { %1755 = vmatpush3.xpose.msk.msra.mxu1 %vm705_vm2, %v870_v42  ;;  %1756 = vmatprep.mubr.msk.f32.mxu1 %vm2323_vm0, %v2324_v1 }
 0x3f2   : > { %1759 = vmatprep.subr.mxu1 %v2324_v1 }
 0x3f3   : > { %1818 = vmatpush3.bf16.msra.mxu0 %v1817_v32 }
 0x3f4   : > { %1757 = vmatmul.mubr.msk.f32.vlgmr.msra.gmra.mrb[6].mxu1 %vm705_vm2, %v868_v43 }
 0x3f5   : > { %1761 = vmatprep.mubr.msk.f32.mxu1 %vm2323_vm0, %v2324_v1 }
 0x4bd   : > { %v1113_v51 = vpop.f32.mrb[4].mxu0 }
 0x4be   : > { %v1768_v52 = vpop.f32.mrb[5].mxu0  ;;  %v1117_v53 = vsel %vm705_vm2, %v1113_v51, -inf }
 0x4bf   : > { %1118 = vmax.xlane.f32.xlu0 %v1117_v53 }
 0x4c1   : > { %v1284_v54 = vpop.f32.mrb[6].mxu0 }
 0x4c2   : > { %v1778_v55 = vpop.f32.mrb[7].mxu0  ;;  %v1288_v61 = vsel %vm705_vm2, %v1284_v54, -inf }
 0x4c3   : > { %v862_v56 = vpop.f32.mrb[4].mxu1 }
 0x4c4   : > { %866 = vst.msk [vmem:[#allocation2] sm:$0xff] %vm705_vm2, %v862_v56  ;;  %v1753_v57 = vpop.f32.mrb[5].mxu1 }
 0x4c7   : > { %v941_v58 = vpop.f32.mrb[6].mxu1 }
 0x4c8   : > { %v1758_v59 = vpop.f32.mrb[7].mxu1  ;;  %v945_v60 = vsel %vm705_vm2, %v941_v58, -inf }
 0x4c9   : > { %946 = vmax.xlane.f32.xlu1 %v945_v60 }
 0x4cd   : > { %1289 = vmax.xlane.f32.xlu1 %v1288_v61 }
 0x54c   : > { %v1119_v62 = vpop.xlane.xlu0 %1118 }
 0x54d   : > { %v1120_v63 = vsub.f32 %v1113_v51, %v1119_v62 }
 0x54f   : > { %v1121_v2 = vmul.f32 1.442695, %v1120_v63 }
 0x551   : > { %1961 = vpow2.f32 %v1121_v2 }
 0x556   : > { %v947_v3 = vpop.xlane.xlu1 %946 }
 0x557   : > { %v948_v11 = vsub.f32 %v941_v58, %v947_v3 }
 0x559   : > { %v949_v12 = vmul.f32 1.442695, %v948_v11 }
 0x55a   : > { %v1290_v4 = vpop.xlane.xlu1 %1289 }
 0x55b   : > { %v1962_v5 = vpop.eup %1961  ;;  %v1291_v6 = vsub.f32 %v1284_v54, %v1290_v4 }
 0x55c   : > { %v1123_v7 = vsel %vm705_vm2, %v1962_v5, 0.0 }
 0x55d   : > { %v1292_v8 = vmul.f32 1.442695, %v1291_v6  ;;  %1124 = vadd.xlane.f32.xlu0 %v1123_v7 }
 0x55f   : > { %1963 = vpow2.f32 %v1292_v8 }
 0x560   : > { %1965 = vpow2.f32 %v949_v12 }
 0x569   : > { %v1964_v9 = vpop.eup %1963 }
 0x56a   : > { %v1294_v10 = vsel %vm705_vm2, %v1964_v9, 0.0  ;;  %v1966_v13 = vpop.eup %1965 }
 0x56b   : > { %1295 = vadd.xlane.f32.xlu1 %v1294_v10  ;;  %v951_v14 = vsel %vm705_vm2, %v1966_v13, 0.0 }
 0x573   : > { %957 = vrot.lane.b32.xlu0 %v2744_v40, %s2325_s16  ;;  %s2797_s16 = scalar_lea.hbm %s2877_s22, %s1672_s21 }
 0x57c   : > { %1128 = vrot.lane.b32.xlu1 %v2744_v40, %s2326_s20  ;;  %s1468_s20 = scalar_lea.sflag [#allocation5], %s2682_s25 }
 0x5a0   : > { %952 = vadd.xlane.f32.xlu1 %v951_v14 }
 0x5b1   : > { %1299 = vrot.lane.b32.xlu1 %v2744_v40, %s2327_s13  ;;  %s2231_s13 = sshll.u32 %s2331_s29, 4  ;;  %s2232_s13 = int_to_ptr.vmem [resolvable:$false] %s2231_s13 }
 0x5b2   : > { %p2234_p2 = scmp.lt.s32.totalorder %s2799_s26, %s2232_s13 }
 0x5ea   : > { %v1125_v15 = vpop.xlane.xlu0 %1124 }
 0x5ee   : > { %v958_v16 = vpop.permute.xlu0 %957 }
 0x5ef   : > { %1760 = vmatpush3.msra.mxu1 %v958_v16 }
 0x5f0   : > { %1769 = vmatprep.subr.mxu1 %v2324_v1 }
 0x5f8   : > { %v1296_v17 = vpop.xlane.xlu1 %1295 }
 0x5fc   : > { %v1129_v18 = vpop.permute.xlu1 %1128 }
 0x62d   : > { %v953_v19 = vpop.xlane.xlu1 %952 }
 0x62e   : > { %1967 = vrcp.f32 %v953_v19 }
 0x62f   : > { %1969 = vrcp.f32 %v1125_v15 }
 0x630   : > { %1971 = vrcp.f32 %v1296_v17 }
 0x631   : > { %v1300_v25 = vpop.permute.xlu1 %1299 }
 0x638   : > { %v1968_v20 = vpop.eup %1967 }
 0x639   : > { %v955_v21 = vmul.f32 %v1968_v20, %v1966_v13  ;;  %v1970_v22 = vpop.eup %1969 }
 0x63a   : > { %v1127_v23 = vmul.f32 %v1970_v22, %v1962_v5  ;;  %v1972_v24 = vpop.eup %1971 }
 0x63b   : > { %1762 = vmatmul.mubr.msk.f32.vlgmr.msra.gmra.mrb[8].mxu1 %vm705_vm2, %v955_v21  ;;  %v1298_v26 = vmul.f32 %v1972_v24, %v1964_v9 }
 0x63c   : > { %1770 = vmatpush3.msra.mxu1 %v1129_v18  ;;  %1771 = vmatprep.mubr.msk.f32.mxu1 %vm2323_vm0, %v2324_v1 }
 0x63d   : > { %1779 = vmatprep.subr.mxu1 %v2324_v1 }
 0x63f   : > { %1772 = vmatmul.mubr.msk.f32.vlgmr.msra.gmra.mrb[10].mxu1 %vm705_vm2, %v1127_v23 }
 0x640   : > { %1780 = vmatpush3.msra.mxu1 %v1300_v25  ;;  %1781 = vmatprep.mubr.msk.f32.mxu1 %vm2323_vm0, %v2324_v1 }
 0x643   : > { %1782 = vmatmul.mubr.msk.f32.vlgmr.msra.gmra.mrb[12].mxu1 %vm705_vm2, %v1298_v26 }
 0x70e   : > { %v1029_v33 = vpop.f32.mrb[8].mxu1 }
 0x70f   : > { %1034 = vrot.lane.b32.xlu0 %v1029_v33, %s2328_s1  ;;  %v1763_v34 = vpop.f32.mrb[9].mxu1  ;;  %s2233_s1 = scalar_lea.vmem %s2232_s13, 256 }
 0x710   : > { %p2235_p3 = scmp.lt.s32.totalorder %s2233_s1, %s2227_s15 }
 0x712   : > { %v1200_v35 = vpop.f32.mrb[10].mxu1  ;;  %p2236_p4 = por %p2235_p3, %p2234_p2 }
 0x713   : > { %1205 = vrot.lane.b32.xlu1 %v1200_v35, %s2329_s27  ;;  %v1773_v1 = vpop.f32.mrb[11].mxu1 }
 0x714   : > { %p2237_p10 = pnand %p2236_p4, %p2230_p0 }
 0x716   : > { %v1371_v36 = vpop.f32.mrb[12].mxu1 }
 0x717   : > { %1376 = vrot.lane.b32.xlu0 %v1371_v36, %s2330_s14  ;;  %v1783_v37 = vpop.f32.mrb[13].mxu1 }
 0x781   : > { %v1035_v38 = vpop.permute.xlu0 %1034 }
 0x782   : > { %1038 = vst.msk [vmem:[#allocation2] sm:$0xff] %vm1037_vm3, %v1035_v38 }
 0x785   : > { %v1206_v0 = vpop.permute.xlu1 %1205 }
 0x786   : > { %1209 = vst.msk [vmem:[#allocation2] sm:$0xff] %vm1208_vm4, %v1206_v0 }
 0x789   : > { %v1377_v39 = vpop.permute.xlu0 %1376 }
 0x78a   : > { %1380 = vst.msk [vmem:[#allocation2] sm:$0xff] %vm1379_vm5, %v1377_v39 }
 0x791   : > { %v1381_v40 = vld [vmem:[#allocation2] sm:$0xff] }
 0x792   : > { %1793 = vmatmul.mubr.msk.f32.vlgmr.msra.gmra.mrb[8].mxu0 %vm468_vm1, %v1381_v40 }
 0x865   : > { %v1462_v42 = vpop.f32.mrb[8].mxu0 }
 0x866   : > { %v1463_v43 = vadd.f32 %v1669_v41, %v1462_v42  ;;  %v1794_v44 = vpop.f32.mrb[9].mxu0 }
 0x868   : > { %1466 = vst.msk [vmem:[%s455_s18] sm:$0xff] %vm468_vm1, %v1463_v43 }
 0x869   : > { %2240 = shalt.err (!%p2237_p10)
}
 0x86a   : > { %s2241_s25 = scalar_lea.hbm %s2797_s16, 128  ;;  %s2245_s21 = scalar_lea.hbm %s2877_s22, 256 }
 0x86b   : > { %p2242_p11 = scmp.ne.s32.totalorder %s2797_s16, %s2241_s25  ;;  %p2246_p7 = scmp.lt.u32.totalorder %s2797_s16, %s2877_s22 }
 0x86c   : > { %p2247_p6 = scmp.lt.u32.totalorder %s2245_s21, %s2241_s25  ;;  %p2249_p12 = scmp.lt.u32.totalorder %s2241_s25, %s2797_s16 }
 0x86d   : > { %p2243_p8 = pnand %p2242_p11, %p2878_p1 }
 0x86e   : > { %p2248_p9 = por %p2247_p6, %p2246_p7 }
 0x86f   : > { %p2244_p5 = pneg %p2243_p8 }
 0x870   : > { %p2250_p13 = por %p2249_p12, %p2248_p9 }
 0x872   : > { %p2251_p0 = pnand %p2250_p13, %p2244_p5 }
 0x874   : > { %2254 = shalt.err (!%p2251_p0)
}
 0x875   : > { %1853 = dma.vmem_to_hbm [thread:$0]  (%p2878_p1), %s2799_s26, 128, %s2797_s16, %s1468_s20  }
 0x876 PF: > { %s1493_s23 = sand.u32 1, %s2297_s30   ;;  %p2879_p2 = scmp.ne.s32.totalorder %s2866_s24, 0 }
 0x877   : > { %p2880_p3 = scmp.ge.s32.totalorder %s2309_s12, 2  ;;  %s1494_s15 = scalar_lea.sflag [#allocation5], %s1493_s23 }
 0x879   : > { %p1885_p4 = pnand %p2880_p3, %p2879_p2 }
 0x87b   : > { %2292 = dma.done.wait (!%p1885_p4), %s1494_s15, 128  }
 0x87c   : > { %2294 = vsyncadd (!%p1885_p4), %s1494_s15, 4294967168  ;;  %p26_p10 = scmp.ge.s32.totalorder %s2606_s19, 4   ;;  %s2881_s30 = smov %s2301_s10 }
 0x87d   : > { %s2882_s10 = smov %s2305_s11  ;;  %s2883_s11 = smov %s2617_s17 }
 0x87e   : > { %s2884_s12 = smov %s2606_s19  ;;  %28 = sbr.rel (!%p26_p10) target bundleno = 12 (0xc), region = 133 }
 0x885   :  { %1499 = vsyncpa [#allocation4], 1 }
 0x886   :  { %1501 = vsyncpa [#allocation4 + $0x1], 1 }
 0x887   :  { %1502 = vsyncpa [#allocation7], 1 }
 0x888   :  { %1503 = vsyncpa [#allocation10], 1 }
 0x889   :  { %1504 = vsyncpa [#allocation13], 1 }
 0x88a   :  { %1505 = vsyncpa [#allocation16], 1 }
 0x88b   :  { %1506 = vsyncpa [#allocation5], 1 }
 0x88c   :  { %1508 = vsyncpa [#allocation5 + $0x1], 1 }

</bundles_post_ra>
